<compile_context>
chip_gen: v7x
topology: tpu7x:2x2x1
jax: 0.10.0
libtpu: 0.0.40
codegen_flags: <defaults>
</compile_context>

<pallas_src>
import functools

import jax
import jax.numpy as jnp
from jax.experimental import pallas as pl
from jax.experimental.pallas import tpu as pltpu

NUM_ITERATIONS = 3


def prepare_latent_caps_weights(W, dtype=jnp.bfloat16):
    """(L, P, D, V) PyTorch parameter -> (P, V, L*D) bf16. Done ONCE at setup."""
    L, P, D, V = W.shape
    return jnp.transpose(W, (1, 3, 0, 2)).reshape(P, V, L * D).astype(dtype)


def _make_kernel(L):
    inv_L = 1.0 / float(L)

    def _squash(s, collapse, expand):
        # ||s_l||^2 per latent capsule via lane-dense mask matmul: (TB,LD)@(LD,L).
        sq = jnp.dot((s * s).astype(jnp.bfloat16), collapse,
                     preferred_element_type=jnp.float32)               # (TB, L)
        # factor = sq / ((1+sq)*sqrt(sq)) = sqrt(sq)/(1+sq). EUP rsqrt + recip.
        # No eps, same as the PyTorch module: an exactly-zero-norm capsule -> NaN.
        factor = sq * jax.lax.rsqrt(sq) * pl.reciprocal(1.0 + sq, approx=True)
        # Broadcast factor over each capsule's D lanes via MXU: (TB,L)@(L,LD).
        return jnp.dot(factor.astype(jnp.bfloat16), expand,
                       preferred_element_type=jnp.float32) * s          # (TB, LD)

    def kernel(collapse_ref, expand_ref, w_ref, x_ref, o_ref, s_acc, v_acc):
        # collapse_ref: (LD, L) bf16   expand_ref: (L, LD) bf16
        # w_ref: (PT, V, LD) bf16      x_ref: (PT, TB, V) bf16
        # o_ref: (TB, LD) f32          s_acc / v_acc: (TB, LD) f32 scratch
        it = pl.program_id(1)
        p = pl.program_id(2)
        n_it = pl.num_programs(1)
        n_p = pl.num_programs(2)

        PT, TB, V = x_ref.shape
        LD = w_ref.shape[-1]

        @pl.when(p == 0)
        def _():
            s_acc[...] = jnp.zeros_like(s_acc)

        # u_hat for this P-tile: PT-batched (TB, V) @ (V, LD) on the MXU,
        # bf16 x bf16 -> f32, lane-dense LD output.
        u_hat = jnp.einsum("ptv,pvn->ptn", x_ref[...], w_ref[...],
                           preferred_element_type=jnp.float32)          # (PT, TB, LD)

        # Iteration 0: b == 0  =>  c == 1/L uniform; skip softmax / expand matmul.
        @pl.when(it == 0)
        def _():
            s_acc[...] += jnp.sum(u_hat, axis=0) * inv_L

        # Later iterations: recompute this tile's routing logits from
        # v_acc = sum of previous iterations' v (b is linear in v), softmax over
        # latent capsules, and accumulate s — all fused in one pass over W.
        @pl.when(it > 0)
        def _():
            u2 = u_hat.reshape(PT * TB, LD)
            uv = (u_hat * v_acc[...][None, :, :]).reshape(PT * TB, LD)
            # b[p*TB+t, l] = sum_d u_hat[p,t,l*D+d] * v_acc[t,l*D+d]
            b = jnp.dot(uv.astype(jnp.bfloat16), collapse_ref[...],
                        preferred_element_type=jnp.float32)             # (PT*TB, L)
            m = jnp.max(b, axis=-1, keepdims=True)
            e = jnp.exp(b - m)
            c = e / jnp.sum(e, axis=-1, keepdims=True)   # exact recip: (PT*TB,1) only
            # Broadcast c over each capsule's D lanes via MXU: (PT*TB,L)@(L,LD).
            c_rep = jnp.dot(c.astype(jnp.bfloat16), expand_ref[...],
                            preferred_element_type=jnp.float32)         # (PT*TB, LD)
            s_acc[...] += jnp.sum((c_rep * u2).reshape(PT, TB, LD), axis=0)

        is_last_p = p == n_p - 1

        # End of iteration 0: v_acc := v_0.
        @pl.when(jnp.logical_and(is_last_p, it == 0))
        def _():
            v_acc[...] = _squash(s_acc[...], collapse_ref[...], expand_ref[...])

        # End of intermediate iterations: v_acc += v_it.
        @pl.when(jnp.logical_and(is_last_p,
                                 jnp.logical_and(it > 0, it < n_it - 1)))
        def _():
            v_acc[...] += _squash(s_acc[...], collapse_ref[...], expand_ref[...])

        # End of last iteration: write the output block (lane-dense LD stores).
        @pl.when(jnp.logical_and(is_last_p, it == n_it - 1))
        def _():
            o_ref[...] = _squash(
                s_acc[...], collapse_ref[...], expand_ref[...]).astype(o_ref.dtype)

    return kernel


@functools.partial(jax.jit, static_argnames=("L", "D", "batch_tile", "p_tile"))
def latent_caps_forward(x, w_r, *, L, D, batch_tile=128, p_tile=8):
    """x: (B, P, V) f32, w_r: (P, V, L*D) bf16 from prepare_latent_caps_weights.

    Returns (B, L, D) f32. batch_tile / p_tile trade u_hat-tile VMEM footprint
    (PT*TB*LD*4 bytes) against MXU utilization and W-stream arithmetic
    intensity; sweep per chip (128/256 batch tiles recommended on v5e/v6e/v7x).
    """
    B, P, V = x.shape
    LD = L * D
    TB = min(batch_tile, B)
    PT = min(p_tile, P)
    assert B % TB == 0, "batch must be divisible by the batch tile"
    assert P % PT == 0, "prim_caps_size must be divisible by the P tile"
    # NOTE(v7x): keep B // TB >= 2 so the "parallel" batch axis can shard
    # across both TensorCores.

    # Small activation transpose + bf16 cast so the in-kernel projection is a
    # clean leading-batch (over P) bf16 matmul; W itself is never touched per call.
    x_t = jnp.transpose(x, (1, 0, 2)).astype(jnp.bfloat16)              # (P, B, V)
    w_r = w_r.astype(jnp.bfloat16)

    # Constant 0/1 masks mapping fused lane axis <-> latent-capsule id, built
    # once per call (outside the kernel) and passed as grid-invariant inputs:
    #   collapse[l*D+d, l'] = (l == l')   (LD, L)
    #   expand  [l', l*D+d] = (l == l')   (L, LD)
    seg = jax.lax.broadcasted_iota(jnp.int32, (LD, L), 0) // D
    col = jax.lax.broadcasted_iota(jnp.int32, (LD, L), 1)
    collapse = (seg == col).astype(jnp.bfloat16)
    expand = jnp.transpose(collapse)

    # Explicit VMEM budget: double-buffered streamed inputs + out block +
    # scratch + ~4 u_hat-sized f32 temporaries, 1.5x headroom, clamped to a
    # range that is safe on v5e/v6e (128 MiB) and v7x (64 MiB).
    f32b, bf16b = 4, 2
    u_tile_bytes = PT * TB * LD * f32b
    stream_bytes = 2 * (PT * V * LD * bf16b + PT * TB * V * bf16b)
    fixed_bytes = 2 * TB * LD * f32b + 2 * (2 * LD * L * bf16b) + 2 * TB * LD * f32b
    est = stream_bytes + fixed_bytes + 4 * u_tile_bytes
    vmem_limit = int(min(max(int(est * 1.5), 32 * 1024 * 1024), 64 * 1024 * 1024))

    out = pl.pallas_call(
        _make_kernel(L),
        out_shape=jax.ShapeDtypeStruct((B, LD), x.dtype),
        grid_spec=pltpu.PrefetchScalarGridSpec(
            num_scalar_prefetch=0,
            # (batch blocks, routing iterations, P tiles); reduction axes last.
            grid=(B // TB, NUM_ITERATIONS, P // PT),
            in_specs=[
                # Grid-invariant masks (constant index_map -> DMA'd once).
                pl.BlockSpec((LD, L), lambda i, it, p: (0, 0)),
                pl.BlockSpec((L, LD), lambda i, it, p: (0, 0)),
                # W streamed one P-tile at a time (double-buffered by default).
                pl.BlockSpec((PT, V, LD), lambda i, it, p: (p, 0, 0)),
                pl.BlockSpec((PT, TB, V), lambda i, it, p: (p, i, 0)),
            ],
            out_specs=pl.BlockSpec((TB, LD), lambda i, it, p: (i, 0)),   # lane-dense
            scratch_shapes=[pltpu.VMEM((TB, LD), jnp.float32),           # s accumulator
                            pltpu.VMEM((TB, LD), jnp.float32)],          # sum of v_j
        ),
        compiler_params=pltpu.CompilerParams(
            dimension_semantics=("parallel", "arbitrary", "arbitrary"),
            vmem_limit_bytes=vmem_limit),
    )(collapse, expand, w_r, x_t)
    return out.reshape(B, L, D)


def latent_caps_reference(x, W):
    # Pure-JAX f32 mirror of the PyTorch forward (detach / Variable / .cuda()
    # are no-ops for forward semantics).
    u_hat = jnp.einsum("lpdv,bpv->blpd", W, x)                           # (B, L, P, D)
    b_ij = jnp.zeros((x.shape[0], W.shape[0], W.shape[1]), jnp.float32)
    v = None
    for it in range(NUM_ITERATIONS):
        c = jax.nn.softmax(b_ij, axis=1)
        s = jnp.sum(c[..., None] * u_hat, axis=2)                        # (B, L, D)
        sq = jnp.sum(s * s, axis=-1, keepdims=True)
        v = sq * s / ((1.0 + sq) * jnp.sqrt(sq))
        if it < NUM_ITERATIONS - 1:
            b_ij = b_ij + jnp.sum(u_hat * v[:, :, None, :], axis=-1)
    return v


if __name__ == "__main__":
    # Small shapes consistent with the module (scaled down from the defaults
    # L=40, P=1024, V=40, D=64). LD = L*D = 128 = one full lane group.
    # Tiles chosen so the test exercises batch blocking (2 steps), all three
    # routing iterations, and the streamed P-reduction axis (4 tiles).
    B, L, P, V, D = 16, 8, 32, 8, 16

    key = jax.random.PRNGKey(0)
    kw, kx = jax.random.split(key)
    W = 0.01 * jax.random.normal(kw, (L, P, D, V), dtype=jnp.float32)   # 0.01*randn init
    x = jax.random.normal(kx, (B, P, V), dtype=jnp.float32)

    W_r = prepare_latent_caps_weights(W)          # one-time parameter setup (bf16)
    out = latent_caps_forward(x, W_r, L=L, D=D, batch_tile=8, p_tile=8)
    out = jax.block_until_ready(out)

    ref = latent_caps_reference(x, W)
    assert out.shape == (B, L, D)
    # Tolerance accounts for bf16 weights/matmuls + EUP approx recip/rsqrt in squash.
    assert jnp.allclose(out, ref, rtol=3e-2, atol=2e-4), "mismatch vs reference"

    print("KERNEL_OK")
</pallas_src>

<mosaic_0001>
module attributes {stable_mosaic.version = 11 : i64} {
  func.func @kernel(%arg0: i32, %arg1: i32, %arg2: i32, %arg3: memref<128x8xbf16, #tpu.memory_space<vmem>>, %arg4: memref<8x128xbf16, #tpu.memory_space<vmem>>, %arg5: memref<8x8x128xbf16, #tpu.memory_space<vmem>>, %arg6: memref<8x8x8xbf16, #tpu.memory_space<vmem>>, %arg7: memref<8x128xf32, #tpu.memory_space<vmem>>, %arg8: memref<8x128xf32, #tpu.memory_space<vmem>>, %arg9: memref<8x128xf32, #tpu.memory_space<vmem>>) attributes {dimension_semantics = [#tpu.dimension_semantics<parallel>, #tpu.dimension_semantics<arbitrary>, #tpu.dimension_semantics<arbitrary>], iteration_bounds = array<i64: 2, 3, 4>, scalar_prefetch = 0 : i64, scratch_operands = 2 : i64, tpu.core_type = #tpu.core_type<tc>, window_params = [{pipeline_mode = #tpu.pipeline_mode<synchronous>, transform_indices = @transform_0, window_bounds = array<i64: 128, 8>}, {pipeline_mode = #tpu.pipeline_mode<synchronous>, transform_indices = @transform_1, window_bounds = array<i64: 8, 128>}, {transform_indices = @transform_2, window_bounds = array<i64: 8, 8, 128>}, {transform_indices = @transform_3, window_bounds = array<i64: 8, 8, 8>}, {transform_indices = @transform_4, window_bounds = array<i64: 8, 128>}]} {
    %c0_i32 = arith.constant 0 : i32
    %0 = arith.cmpi eq, %arg2, %c0_i32 : i32
    %1 = arith.extui %0 : i1 to i32
    %c0_i32_0 = arith.constant 0 : i32
    %2 = arith.cmpi ne, %1, %c0_i32_0 : i32
    scf.if %2 {
      %cst_16 = arith.constant 0.000000e+00 : f32
      %27 = vector.broadcast %cst_16 : f32 to vector<8x128xf32>
      %c0_17 = arith.constant 0 : index
      %c0_18 = arith.constant 0 : index
      %28 = vector.load %arg8[%c0_17, %c0_18] : memref<8x128xf32, #tpu.memory_space<vmem>>, vector<8x128xf32>
      tpu.vector_store %arg8[%c0_17, %c0_18], %27 {strides = array<i32>} : memref<8x128xf32, #tpu.memory_space<vmem>>, vector<8x128xf32>,
    } else {
    }
    %c0 = arith.constant 0 : index
    %c0_1 = arith.constant 0 : index
    %c0_2 = arith.constant 0 : index
    %3 = vector.load %arg6[%c0, %c0_1, %c0_2] : memref<8x8x8xbf16, #tpu.memory_space<vmem>>, vector<8x8x8xbf16>
    %c0_3 = arith.constant 0 : index
    %c0_4 = arith.constant 0 : index
    %c0_5 = arith.constant 0 : index
    %4 = vector.load %arg5[%c0_3, %c0_4, %c0_5] : memref<8x8x128xbf16, #tpu.memory_space<vmem>>, vector<8x8x128xbf16>
    "tpu.trace_start"() <{level = 10 : i32, message = "ptv,pvn->ptn"}> : () -> ()
    %cst = arith.constant dense<0.000000e+00> : vector<8x8x128xf32>
    %5 = tpu.matmul %3, %4, %cst {dimension_numbers = #tpu.dot_dimension_numbers<[2], [1], [1], [2], [0, 0, 0, 1, 1, 2], [0], [0]>} : vector<8x8x8xbf16>, vector<8x8x128xbf16>, vector<8x8x128xf32> -> vector<8x8x128xf32>
    %c0_i32_6 = arith.constant 0 : i32
    "tpu.trace_stop"() : () -> ()
    %6 = arith.cmpi eq, %arg1, %c0_i32_6 : i32
    %7 = arith.extui %6 : i1 to i32
    %c0_i32_7 = arith.constant 0 : i32
    %8 = arith.cmpi ne, %7, %c0_i32_7 : i32
    scf.if %8 {
      %c0_16 = arith.constant 0 : index
      %c0_17 = arith.constant 0 : index
      %27 = vector.load %arg8[%c0_16, %c0_17] : memref<8x128xf32, #tpu.memory_space<vmem>>, vector<8x128xf32>
      %cst_18 = arith.constant dense<0.000000e+00> : vector<8x128xf32>
      %28 = vector.multi_reduction <add>, %5, %cst_18 [0] : vector<8x8x128xf32> to vector<8x128xf32>
      %cst_19 = arith.constant 1.250000e-01 : f32
      %29 = vector.broadcast %cst_19 : f32 to vector<8x128xf32>
      %30 = arith.mulf %28, %29 : vector<8x128xf32>
      %31 = arith.addf %27, %30 : vector<8x128xf32>
      %c0_20 = arith.constant 0 : index
      %c0_21 = arith.constant 0 : index
      %32 = vector.load %arg8[%c0_20, %c0_21] : memref<8x128xf32, #tpu.memory_space<vmem>>, vector<8x128xf32>
      tpu.vector_store %arg8[%c0_20, %c0_21], %31 {strides = array<i32>} : memref<8x128xf32, #tpu.memory_space<vmem>>, vector<8x128xf32>,
    } else {
    }
    %c0_i32_8 = arith.constant 0 : i32
    %9 = arith.cmpi sgt, %arg1, %c0_i32_8 : i32
    %10 = arith.extui %9 : i1 to i32
    %c0_i32_9 = arith.constant 0 : i32
    %11 = arith.cmpi ne, %10, %c0_i32_9 : i32
    scf.if %11 {
      %27 = vector.shape_cast %5 : vector<8x8x128xf32> to vector<64x128xf32>
      %c0_16 = arith.constant 0 : index
      %c0_17 = arith.constant 0 : index
      %28 = vector.load %arg9[%c0_16, %c0_17] : memref<8x128xf32, #tpu.memory_space<vmem>>, vector<8x128xf32>
      %29 = vector.shape_cast %28 : vector<8x128xf32> to vector<1x8x128xf32>
      %30 = vector.broadcast %29 : vector<1x8x128xf32> to vector<8x8x128xf32>
      %31 = arith.mulf %5, %30 : vector<8x8x128xf32>
      %32 = vector.shape_cast %31 : vector<8x8x128xf32> to vector<64x128xf32>
      %33 = arith.truncf %32 : vector<64x128xf32> to vector<64x128xbf16>
      %c0_18 = arith.constant 0 : index
      %c0_19 = arith.constant 0 : index
      %34 = vector.load %arg3[%c0_18, %c0_19] : memref<128x8xbf16, #tpu.memory_space<vmem>>, vector<128x8xbf16>
      %cst_20 = arith.constant dense<0.000000e+00> : vector<64x8xf32>
      %35 = tpu.matmul %33, %34, %cst_20 {dimension_numbers = #tpu.dot_dimension_numbers<[1], [0], [0], [1], [0, 0, 1, 1], [], []>} : vector<64x128xbf16>, vector<128x8xbf16>, vector<64x8xf32> -> vector<64x8xf32>
      %cst_21 = arith.constant dense<0xFF800000> : vector<64xf32>
      %36 = vector.multi_reduction <maximumf>, %35, %cst_21 [1] : vector<64x8xf32> to vector<64xf32>
      %37 = vector.shape_cast %36 : vector<64xf32> to vector<64x1xf32>
      %38 = vector.broadcast %37 : vector<64x1xf32> to vector<64x8xf32>
      %39 = arith.subf %35, %38 : vector<64x8xf32>
      %40 = math.exp %39 : vector<64x8xf32>
      %cst_22 = arith.constant dense<0.000000e+00> : vector<64xf32>
      %41 = vector.multi_reduction <add>, %40, %cst_22 [1] : vector<64x8xf32> to vector<64xf32>
      %42 = vector.shape_cast %41 : vector<64xf32> to vector<64x1xf32>
      %43 = vector.broadcast %42 : vector<64x1xf32> to vector<64x8xf32>
      %44 = arith.divf %40, %43 : vector<64x8xf32>
      %45 = arith.truncf %44 : vector<64x8xf32> to vector<64x8xbf16>
      %c0_23 = arith.constant 0 : index
      %c0_24 = arith.constant 0 : index
      %46 = vector.load %arg4[%c0_23, %c0_24] : memref<8x128xbf16, #tpu.memory_space<vmem>>, vector<8x128xbf16>
      %cst_25 = arith.constant dense<0.000000e+00> : vector<64x128xf32>
      %47 = tpu.matmul %45, %46, %cst_25 {dimension_numbers = #tpu.dot_dimension_numbers<[1], [0], [0], [1], [0, 0, 1, 1], [], []>} : vector<64x8xbf16>, vector<8x128xbf16>, vector<64x128xf32> -> vector<64x128xf32>
      %c0_26 = arith.constant 0 : index
      %c0_27 = arith.constant 0 : index
      %48 = vector.load %arg8[%c0_26, %c0_27] : memref<8x128xf32, #tpu.memory_space<vmem>>, vector<8x128xf32>
      %49 = arith.mulf %47, %27 : vector<64x128xf32>
      %50 = vector.shape_cast %49 : vector<64x128xf32> to vector<8x8x128xf32>
      %cst_28 = arith.constant dense<0.000000e+00> : vector<8x128xf32>
      %51 = vector.multi_reduction <add>, %50, %cst_28 [0] : vector<8x8x128xf32> to vector<8x128xf32>
      %52 = arith.addf %48, %51 : vector<8x128xf32>
      %c0_29 = arith.constant 0 : index
      %c0_30 = arith.constant 0 : index
      %53 = vector.load %arg8[%c0_29, %c0_30] : memref<8x128xf32, #tpu.memory_space<vmem>>, vector<8x128xf32>
      tpu.vector_store %arg8[%c0_29, %c0_30], %52 {strides = array<i32>} : memref<8x128xf32, #tpu.memory_space<vmem>>, vector<8x128xf32>,
    } else {
    }
    %c3_i32 = arith.constant 3 : i32
    %12 = arith.cmpi eq, %arg2, %c3_i32 : i32
    %c0_i32_10 = arith.constant 0 : i32
    %13 = arith.cmpi eq, %arg1, %c0_i32_10 : i32
    %14 = arith.andi %12, %13 : i1
    %15 = arith.extui %14 : i1 to i32
    %c0_i32_11 = arith.constant 0 : i32
    %16 = arith.cmpi ne, %15, %c0_i32_11 : i32
    scf.if %16 {
      %c0_16 = arith.constant 0 : index
      %c0_17 = arith.constant 0 : index
      %27 = vector.load %arg8[%c0_16, %c0_17] : memref<8x128xf32, #tpu.memory_space<vmem>>, vector<8x128xf32>
      %c0_18 = arith.constant 0 : index
      %c0_19 = arith.constant 0 : index
      %28 = vector.load %arg3[%c0_18, %c0_19] : memref<128x8xbf16, #tpu.memory_space<vmem>>, vector<128x8xbf16>
      %c0_20 = arith.constant 0 : index
      %c0_21 = arith.constant 0 : index
      %29 = vector.load %arg4[%c0_20, %c0_21] : memref<8x128xbf16, #tpu.memory_space<vmem>>, vector<8x128xbf16>
      %30 = arith.mulf %27, %27 : vector<8x128xf32>
      %31 = arith.truncf %30 : vector<8x128xf32> to vector<8x128xbf16>
      %cst_22 = arith.constant dense<0.000000e+00> : vector<8x8xf32>
      %32 = tpu.matmul %31, %28, %cst_22 {dimension_numbers = #tpu.dot_dimension_numbers<[1], [0], [0], [1], [0, 0, 1, 1], [], []>} : vector<8x128xbf16>, vector<128x8xbf16>, vector<8x8xf32> -> vector<8x8xf32>
      %33 = math.rsqrt %32 : vector<8x8xf32>
      %34 = arith.mulf %32, %33 : vector<8x8xf32>
      %cst_23 = arith.constant 1.000000e+00 : f32
      %35 = vector.broadcast %cst_23 : f32 to vector<8x8xf32>
      %36 = arith.addf %35, %32 : vector<8x8xf32>
      %37 = tpu.reciprocal %36 {approx = true} : vector<8x8xf32> -> vector<8x8xf32>
      %38 = arith.mulf %34, %37 : vector<8x8xf32>
      %39 = arith.truncf %38 : vector<8x8xf32> to vector<8x8xbf16>
      %cst_24 = arith.constant dense<0.000000e+00> : vector<8x128xf32>
      %40 = tpu.matmul %39, %29, %cst_24 {dimension_numbers = #tpu.dot_dimension_numbers<[1], [0], [0], [1], [0, 0, 1, 1], [], []>} : vector<8x8xbf16>, vector<8x128xbf16>, vector<8x128xf32> -> vector<8x128xf32>
      %41 = arith.mulf %40, %27 : vector<8x128xf32>
      %c0_25 = arith.constant 0 : index
      %c0_26 = arith.constant 0 : index
      %42 = vector.load %arg9[%c0_25, %c0_26] : memref<8x128xf32, #tpu.memory_space<vmem>>, vector<8x128xf32>
      tpu.vector_store %arg9[%c0_25, %c0_26], %41 {strides = array<i32>} : memref<8x128xf32, #tpu.memory_space<vmem>>, vector<8x128xf32>,
    } else {
    }
    %c0_i32_12 = arith.constant 0 : i32
    %17 = arith.cmpi sgt, %arg1, %c0_i32_12 : i32
    %c2_i32 = arith.constant 2 : i32
    %18 = arith.cmpi slt, %arg1, %c2_i32 : i32
    %19 = arith.andi %17, %18 : i1
    %20 = arith.andi %12, %19 : i1
    %21 = arith.extui %20 : i1 to i32
    %c0_i32_13 = arith.constant 0 : i32
    %22 = arith.cmpi ne, %21, %c0_i32_13 : i32
    scf.if %22 {
      %c0_16 = arith.constant 0 : index
      %c0_17 = arith.constant 0 : index
      %27 = vector.load %arg9[%c0_16, %c0_17] : memref<8x128xf32, #tpu.memory_space<vmem>>, vector<8x128xf32>
      %c0_18 = arith.constant 0 : index
      %c0_19 = arith.constant 0 : index
      %28 = vector.load %arg8[%c0_18, %c0_19] : memref<8x128xf32, #tpu.memory_space<vmem>>, vector<8x128xf32>
      %c0_20 = arith.constant 0 : index
      %c0_21 = arith.constant 0 : index
      %29 = vector.load %arg3[%c0_20, %c0_21] : memref<128x8xbf16, #tpu.memory_space<vmem>>, vector<128x8xbf16>
      %c0_22 = arith.constant 0 : index
      %c0_23 = arith.constant 0 : index
      %30 = vector.load %arg4[%c0_22, %c0_23] : memref<8x128xbf16, #tpu.memory_space<vmem>>, vector<8x128xbf16>
      %31 = arith.mulf %28, %28 : vector<8x128xf32>
      %32 = arith.truncf %31 : vector<8x128xf32> to vector<8x128xbf16>
      %cst_24 = arith.constant dense<0.000000e+00> : vector<8x8xf32>
      %33 = tpu.matmul %32, %29, %cst_24 {dimension_numbers = #tpu.dot_dimension_numbers<[1], [0], [0], [1], [0, 0, 1, 1], [], []>} : vector<8x128xbf16>, vector<128x8xbf16>, vector<8x8xf32> -> vector<8x8xf32>
      %34 = math.rsqrt %33 : vector<8x8xf32>
      %35 = arith.mulf %33, %34 : vector<8x8xf32>
      %cst_25 = arith.constant 1.000000e+00 : f32
      %36 = vector.broadcast %cst_25 : f32 to vector<8x8xf32>
      %37 = arith.addf %36, %33 : vector<8x8xf32>
      %38 = tpu.reciprocal %37 {approx = true} : vector<8x8xf32> -> vector<8x8xf32>
      %39 = arith.mulf %35, %38 : vector<8x8xf32>
      %40 = arith.truncf %39 : vector<8x8xf32> to vector<8x8xbf16>
      %cst_26 = arith.constant dense<0.000000e+00> : vector<8x128xf32>
      %41 = tpu.matmul %40, %30, %cst_26 {dimension_numbers = #tpu.dot_dimension_numbers<[1], [0], [0], [1], [0, 0, 1, 1], [], []>} : vector<8x8xbf16>, vector<8x128xbf16>, vector<8x128xf32> -> vector<8x128xf32>
      %42 = arith.mulf %41, %28 : vector<8x128xf32>
      %43 = arith.addf %27, %42 : vector<8x128xf32>
      %c0_27 = arith.constant 0 : index
      %c0_28 = arith.constant 0 : index
      %44 = vector.load %arg9[%c0_27, %c0_28] : memref<8x128xf32, #tpu.memory_space<vmem>>, vector<8x128xf32>
      tpu.vector_store %arg9[%c0_27, %c0_28], %43 {strides = array<i32>} : memref<8x128xf32, #tpu.memory_space<vmem>>, vector<8x128xf32>,
    } else {
    }
    %c2_i32_14 = arith.constant 2 : i32
    %23 = arith.cmpi eq, %arg1, %c2_i32_14 : i32
    %24 = arith.andi %12, %23 : i1
    %25 = arith.extui %24 : i1 to i32
    %c0_i32_15 = arith.constant 0 : i32
    %26 = arith.cmpi ne, %25, %c0_i32_15 : i32
    scf.if %26 {
      %c0_16 = arith.constant 0 : index
      %c0_17 = arith.constant 0 : index
      %27 = vector.load %arg8[%c0_16, %c0_17] : memref<8x128xf32, #tpu.memory_space<vmem>>, vector<8x128xf32>
      %c0_18 = arith.constant 0 : index
      %c0_19 = arith.constant 0 : index
      %28 = vector.load %arg3[%c0_18, %c0_19] : memref<128x8xbf16, #tpu.memory_space<vmem>>, vector<128x8xbf16>
      %c0_20 = arith.constant 0 : index
      %c0_21 = arith.constant 0 : index
      %29 = vector.load %arg4[%c0_20, %c0_21] : memref<8x128xbf16, #tpu.memory_space<vmem>>, vector<8x128xbf16>
      %30 = arith.mulf %27, %27 : vector<8x128xf32>
      %31 = arith.truncf %30 : vector<8x128xf32> to vector<8x128xbf16>
      %cst_22 = arith.constant dense<0.000000e+00> : vector<8x8xf32>
      %32 = tpu.matmul %31, %28, %cst_22 {dimension_numbers = #tpu.dot_dimension_numbers<[1], [0], [0], [1], [0, 0, 1, 1], [], []>} : vector<8x128xbf16>, vector<128x8xbf16>, vector<8x8xf32> -> vector<8x8xf32>
      %33 = math.rsqrt %32 : vector<8x8xf32>
      %34 = arith.mulf %32, %33 : vector<8x8xf32>
      %cst_23 = arith.constant 1.000000e+00 : f32
      %35 = vector.broadcast %cst_23 : f32 to vector<8x8xf32>
      %36 = arith.addf %35, %32 : vector<8x8xf32>
      %37 = tpu.reciprocal %36 {approx = true} : vector<8x8xf32> -> vector<8x8xf32>
      %38 = arith.mulf %34, %37 : vector<8x8xf32>
      %39 = arith.truncf %38 : vector<8x8xf32> to vector<8x8xbf16>
      %cst_24 = arith.constant dense<0.000000e+00> : vector<8x128xf32>
      %40 = tpu.matmul %39, %29, %cst_24 {dimension_numbers = #tpu.dot_dimension_numbers<[1], [0], [0], [1], [0, 0, 1, 1], [], []>} : vector<8x8xbf16>, vector<8x128xbf16>, vector<8x128xf32> -> vector<8x128xf32>
      %41 = arith.mulf %40, %27 : vector<8x128xf32>
      %c0_25 = arith.constant 0 : index
      %c0_26 = arith.constant 0 : index
      %42 = vector.load %arg7[%c0_25, %c0_26] : memref<8x128xf32, #tpu.memory_space<vmem>>, vector<8x128xf32>
      tpu.vector_store %arg7[%c0_25, %c0_26], %41 {strides = array<i32>} : memref<8x128xf32, #tpu.memory_space<vmem>>, vector<8x128xf32>,
    } else {
    }
    return
  }
  func.func @transform_0(%arg0: i32, %arg1: i32, %arg2: i32) -> (i32, i32) {
    %c0_i32 = arith.constant 0 : i32
    %c0_i32_0 = arith.constant 0 : i32
    %c0_i32_1 = arith.constant 0 : i32
    return %c0_i32, %c0_i32_0 : i32, i32
  }
  func.func @transform_1(%arg0: i32, %arg1: i32, %arg2: i32) -> (i32, i32) {
    %c0_i32 = arith.constant 0 : i32
    %c0_i32_0 = arith.constant 0 : i32
    %c0_i32_1 = arith.constant 0 : i32
    return %c0_i32, %c0_i32_0 : i32, i32
  }
  func.func @transform_2(%arg0: i32, %arg1: i32, %arg2: i32) -> (i32, i32, i32) {
    %c0_i32 = arith.constant 0 : i32
    %c0_i32_0 = arith.constant 0 : i32
    %c0_i32_1 = arith.constant 0 : i32
    return %arg2, %c0_i32, %c0_i32_0 : i32, i32, i32
  }
  func.func @transform_3(%arg0: i32, %arg1: i32, %arg2: i32) -> (i32, i32, i32) {
    %c0_i32 = arith.constant 0 : i32
    %c0_i32_0 = arith.constant 0 : i32
    return %arg2, %arg0, %c0_i32 : i32, i32, i32
  }
  func.func @transform_4(%arg0: i32, %arg1: i32, %arg2: i32) -> (i32, i32) {
    %c0_i32 = arith.constant 0 : i32
    %c0_i32_0 = arith.constant 0 : i32
    return %arg0, %c0_i32 : i32, i32
  }
}

</mosaic_0001>

<bundles_post_ra>
// kernel: latent_caps_forward.1
= control target key start
LH: loop header
LB: loop body
LE: loop exit
PB: predicated region body
PF: predicated region fallthrough
CT: control target
= control target key end

     0   :  { %s2207_s15 = smov 0   ;;  %s2209_s16 = smov 0   ;;  %s2561_s0 = inlined_call_operand.vmem [shape: bf16[128,8], index: 0, kind: input, shape index: {}]   ;;  %s2562_s1 = inlined_call_operand.vmem [shape: bf16[8,128], index: 1, kind: input, shape index: {}]   ;;  %s2563_s2 = inlined_call_operand.vmem [shape: bf16[32,8,128], index: 2, kind: input, shape index: {}]   ;;  %s2564_s3 = inlined_call_operand.vmem [shape: bf16[32,16,8], index: 3, kind: input, shape index: {}]   ;;  %s2565_s4 = inlined_call_operand.vmem [shape: f32[16,128], index: 4, kind: output, shape index: {}]  }
   0x1   :  { %s2211_s17 = smov 0   ;;  %s2213_s18 = smov 0  }
   0x2   :  { %s2215_s19 = smov 0   ;;  %s2217_s20 = smov 0  }
   0x3   :  { %s2219_s21 = smov 0   ;;  %s2221_s22 = smov 0  }
   0x4   :  { %s2223_s23 = smov 0  }
   0x5 LB: > { %s26_s24 = sadd.s32 1, %s2159_s20  ;;  %s29_s25 = sadd.s32 1, %s2163_s21  ;;  %s2171_s23 = sphi %s2223_s23, %s14_s23   ;;  %s2167_s22 = sphi %s2221_s22, %s2573_s22   ;;  %s2163_s21 = sphi %s2219_s21, %s2572_s21   ;;  %s2159_s20 = sphi %s2217_s20, %s2571_s20   ;;  %s2155_s19 = sphi %s2215_s19, %s2570_s19   ;;  %s2151_s18 = sphi %s2213_s18, %s2569_s18   ;;  %s2147_s17 = sphi %s2211_s17, %s2568_s17   ;;  %s2143_s16 = sphi %s2209_s16, %s2567_s16   ;;  %s2139_s15 = sphi %s2207_s15, %s2566_s15  }
   0x6   : > { %p27_p0 = scmp.ge.s32.totalorder %s26_s24, 4  ;;  %p117_p1 = scmp.ne.s32.totalorder %s2143_s16, %s2139_s15 }
   0x7   : > { %p118_p2 = scmp.eq.s32.totalorder %s2171_s23, 0  ;;  %s33_s26 = sadd.s32 1, %s2167_s22 }
   0x8   : > { %s2575_s24 = smov (%p27_p0, %s26_s24), 0  ;;  %s2577_s25 = smov (!%p27_p0, %s29_s25), %s2163_s21 }
   0x9   : > { %p31_p3 = scmp.ge.s32.totalorder %s2577_s25, 3  ;;  %p119_p4 = por %p118_p2, %p117_p1 }
   0xa   : > { %s105_s27 = ssub.s32 %s2159_s20, %s2575_s24  ;;  %s110_s30 = sadd.s32 1, %s2143_s16 }
   0xb   : > { %s2579_s25 = smov (%p31_p3, %s2577_s25), 0  ;;  %s2581_s26 = smov (!%p31_p3, %s33_s26), %s2167_s22 }
   0xc   : > { %p35_p5 = scmp.ge.s32.totalorder %s2581_s26, 2  ;;  %p1654_p7 = scmp.ge.s32.totalorder %s2171_s23, 24 }
   0xe   : > { %s2583_s26 = smov (%p35_p5, %s2581_s26), 0  ;;  %175 = sbr.rel (%p1654_p7) target bundleno = 32 (0x20), region = 24 }
   0xf   : > { %s106_s28 = ssub.s32 %s2167_s22, %s2583_s26 }
  0x10   : > { %s107_s29 = sor.u32 %s106_s28, %s105_s27 }
  0x11   : > { %p108_p6 = scmp.eq.s32.totalorder %s107_s29, 0 }
  0x13   : > { %s2272_s5 = scalar_select %p108_p6, %s2143_s16, %s110_s30  }
  0x15   : > { %187 = sbr.rel (!%p119_p4) target bundleno = 32 (0x20), region = 32  ;;  %s189_s6 = sand.u32 (%p119_p4), 1, %s2143_s16  }
  0x16   : > { %s1716_s7 = sshll.u32 (%p119_p4), %s2159_s20, 4  ;;  %s1655_s8 = sshll.u32 (%p119_p4), %s189_s6, 5 }
  0x17   : > { %s194_s9 = sadd.s32 (%p119_p4), %s2167_s22, %s1716_s7  ;;  %s191_s14 = scalar_lea.vmem (%p119_p4), [#allocation4], %s1655_s8 }
  0x18   : > { %s1658_s10 = sshll.u32 (%p119_p4), %s194_s9, 2 }
  0x19   : > { %s196_s13 = scalar_lea.vmem (%p119_p4), %s2564_s3, %s1658_s10 }
  0x1a   : > { %v212_v0 = vld [vmem:[%s196_s13] sm:$0xf] (%p119_p4)  ;;  %v214_v1 = vld [vmem:[%s196_s13 + $0x8] sm:$0xf] (%p119_p4)  ;;  %v216_v2 = vld [vmem:[%s196_s13 + $0x10] sm:$0xf] (%p119_p4) }
  0x1b   : > { %213 = vst [vmem:[%s191_s14] sm:$0xf] (%p119_p4), %v212_v0  ;;  %215 = vst [vmem:[%s191_s14 + $0x4] sm:$0xf] (%p119_p4), %v214_v1  ;;  %v218_v3 = vld [vmem:[%s196_s13 + $0x18] sm:$0xf] (%p119_p4) }
  0x1c   : > { %217 = vst [vmem:[%s191_s14 + $0x8] sm:$0xf] %v216_v2  ;;  %v220_v4 = vld [vmem:[%s196_s13 + $0x20] sm:$0xf]  ;;  %v222_v5 = vld [vmem:[%s196_s13 + $0x28] sm:$0xf] }
  0x1d   : > { %219 = vst [vmem:[%s191_s14 + $0xc] sm:$0xf] %v218_v3  ;;  %221 = vst [vmem:[%s191_s14 + $0x10] sm:$0xf] %v220_v4  ;;  %v224_v6 = vld [vmem:[%s196_s13 + $0x30] sm:$0xf] }
  0x1e   : > { %223 = vst [vmem:[%s191_s14 + $0x14] sm:$0xf] %v222_v5  ;;  %v226_v7 = vld [vmem:[%s196_s13 + $0x38] sm:$0xf]  ;;  %225 = vst [vmem:[%s191_s14 + $0x18] sm:$0xf] %v224_v6 }
  0x1f   : > { %227 = vst [vmem:[%s191_s14 + $0x1c] sm:$0xf] %v226_v7 }
  0x20 PF: > { %p1659_p8 = scmp.ge.s32.totalorder %s2171_s23, 1  ;;  %p265_p9 = scmp.lt.s32.totalorder %s2171_s23, 25 }
  0x22   : > { %p266_p10 = pnand %p1659_p8, %p265_p9 }
  0x23   : > { %s272_s27 = sand.u32 (!%p266_p10), 1, %s2139_s15   ;;  %s1661_s28 = sshll.u32 (!%p266_p10), %s2147_s17, 3 }
  0x24   : > { %269 = sbr.rel (%p266_p10) target bundleno = 2554 (0x9fa), region = 73  ;;  %s1660_s29 = sshll.u32 (!%p266_p10), %s272_s27, 5 }
  0x25   : > { %p302_p11 = scmp.lt.s32.totalorder (!%p266_p10), %s1661_s28, 31  ;;  %p308_p12 = scmp.lt.s32.totalorder (!%p266_p10), %s2155_s19, 1 }
  0x26   : > { %s2297_s13 = scalar_lea.vmem (!%p266_p10), [#allocation4], %s1660_s29  ;;  %p1664_p13 = scmp.ne.s32.totalorder (!%p266_p10), %s2147_s17, 0 }
  0x2b   : > { %s2585_s28 = smov (!%p302_p11, %s1661_s28), 31  ;;  %s2587_s19 = smov (!%p308_p12, %s2155_s19), 1 }
  0x2c   : > { %s1662_s30 = sshll.u32 %s2585_s28, 2  ;;  %s1663_s9 = sshll.u32 %s2587_s19, 3  ;;  %v2173_v8 = vmov (!%p1664_p13), 0.0  }
  0x2d   : > { %s2290_s8 = scalar_lea.vmem %s2563_s2, %s1662_s30  ;;  %s2295_s12 = scalar_lea.vmem %s2565_s4, %s1663_s9  ;;  %317 = vst [vmem:[#allocation2] sm:$0xff] (!%p1664_p13), %v2173_v8 }
  0x2e   : > { %316 = sbr.rel (%p1664_p13) target bundleno = 53 (0x35), region = 81 }
  0x35 PF: > { %v326_v9 = vld [vmem:[%s2290_s8] sm:$0xf]  ;;  %vm338_vm0 = vcmask 1043456   ;;  %v327_v10 = vld [vmem:[%s2290_s8 + $0x4] sm:$0xf]  ;;  %v2174_v11 = vmov 0.0  }
  0x36   : > { %1783 = vmatprep.subr.bf16.mxu0 %v2174_v11  ;;  %1789 = vmatprep.subr.bf16.mxu1 %v2174_v11  ;;  %v340_v12 = vsel %vm338_vm0, %v326_v9, 0  ;;  %v386_v13 = vsel %vm338_vm0, %v327_v10, 0  ;;  %v318_v14 = vld [vmem:[%s2297_s13] sm:$0xf]  ;;  %vm334_vm1 = vcmask 64512   ;;  %vm2175_vm2 = vmmov 0  }
  0x37   : > { %1784 = vmatpush3.bf16.msra.mxu0 %v340_v12  ;;  %1790 = vmatpush3.bf16.msra.mxu1 %v386_v13  ;;  %v319_v15 = vld [vmem:[%s2297_s13 + $0x4] sm:$0xf]  ;;  %v328_v16 = vld [vmem:[%s2290_s8 + $0x8] sm:$0xf]  ;;  %v329_v17 = vld [vmem:[%s2290_s8 + $0xc] sm:$0xf] }
  0x38   : > { %1785 = vmatprep.mubr.msk.bf16.mxu0 %vm2175_vm2, %v2174_v11  ;;  %1791 = vmatprep.mubr.msk.bf16.mxu1 %vm2175_vm2, %v2174_v11  ;;  %v432_v18 = vsel %vm338_vm0, %v328_v16, 0  ;;  %v478_v19 = vsel %vm338_vm0, %v329_v17, 0  ;;  %v330_v20 = vld [vmem:[%s2290_s8 + $0x10] sm:$0xf]  ;;  %v331_v21 = vld [vmem:[%s2290_s8 + $0x14] sm:$0xf] }
  0x39   : > { %1795 = vmatprep.subr.bf16.mxu0 %v2174_v11  ;;  %1801 = vmatprep.subr.bf16.mxu1 %v2174_v11  ;;  %v320_v22 = vld [vmem:[%s2297_s13 + $0x8] sm:$0xf]  ;;  %v321_v23 = vld [vmem:[%s2297_s13 + $0xc] sm:$0xf]  ;;  %v524_v24 = vsel %vm338_vm0, %v330_v20, 0  ;;  %v570_v25 = vsel %vm338_vm0, %v331_v21, 0 }
  0x3a   : > { %1786 = vmatmul.mubr.msk.bf16.vlgmr.msra.gmra.mrb[0].mxu0 %vm334_vm1, %v318_v14  ;;  %1792 = vmatmul.mubr.msk.bf16.vlgmr.msra.gmra.mrb[0].mxu1 %vm334_vm1, %v319_v15  ;;  %v332_v26 = vld [vmem:[%s2290_s8 + $0x18] sm:$0xf]  ;;  %v333_v27 = vld [vmem:[%s2290_s8 + $0x1c] sm:$0xf]  ;;  %v322_v28 = vld [vmem:[%s2297_s13 + $0x10] sm:$0xf] }
  0x3b   : > { %1796 = vmatpush3.bf16.msra.mxu0 %v432_v18  ;;  %1802 = vmatpush3.bf16.msra.mxu1 %v478_v19  ;;  %v323_v29 = vld [vmem:[%s2297_s13 + $0x14] sm:$0xf]  ;;  %v616_v30 = vsel %vm338_vm0, %v332_v26, 0  ;;  %v662_v31 = vsel %vm338_vm0, %v333_v27, 0  ;;  %v324_v32 = vld [vmem:[%s2297_s13 + $0x18] sm:$0xf] }
  0x3c   : > { %1797 = vmatprep.mubr.msk.bf16.mxu0 %vm2175_vm2, %v2174_v11  ;;  %1803 = vmatprep.mubr.msk.bf16.mxu1 %vm2175_vm2, %v2174_v11  ;;  %v325_v33 = vld [vmem:[%s2297_s13 + $0x1c] sm:$0xf]  ;;  %p704_p0 = scmp.eq.s32.totalorder %s2151_s18, 0  ;;  %p1673_p1 = scmp.ne.s32.totalorder %s2151_s18, 0 }
  0x3d   : > { %1807 = vmatprep.subr.bf16.mxu0 %v2174_v11  ;;  %1813 = vmatprep.subr.bf16.mxu1 %v2174_v11  ;;  %v708_v9 = vld [vmem:[#allocation2] sm:$0xff] (!%p1673_p1) }
  0x42   : > { %1798 = vmatmul.mubr.msk.bf16.vlgmr.msra.gmra.mrb[4].mxu0 %vm334_vm1, %v320_v22  ;;  %1804 = vmatmul.mubr.msk.bf16.vlgmr.msra.gmra.mrb[4].mxu1 %vm334_vm1, %v321_v23 }
  0x43   : > { %1808 = vmatpush3.bf16.msra.mxu0 %v524_v24  ;;  %1814 = vmatpush3.bf16.msra.mxu1 %v570_v25 }
  0x44   : > { %1809 = vmatprep.mubr.msk.bf16.mxu0 %vm2175_vm2, %v2174_v11  ;;  %1815 = vmatprep.mubr.msk.bf16.mxu1 %vm2175_vm2, %v2174_v11 }
  0x45   : > { %1819 = vmatprep.subr.bf16.mxu0 %v2174_v11  ;;  %1825 = vmatprep.subr.bf16.mxu1 %v2174_v11 }
  0x4a   : > { %1810 = vmatmul.mubr.msk.bf16.vlgmr.msra.gmra.mrb[8].mxu0 %vm334_vm1, %v322_v28  ;;  %1816 = vmatmul.mubr.msk.bf16.vlgmr.msra.gmra.mrb[8].mxu1 %vm334_vm1, %v323_v29 }
  0x4b   : > { %1820 = vmatpush3.bf16.msra.mxu0 %v616_v30  ;;  %1826 = vmatpush3.bf16.msra.mxu1 %v662_v31 }
  0x4c   : > { %1821 = vmatprep.mubr.msk.bf16.mxu0 %vm2175_vm2, %v2174_v11  ;;  %1827 = vmatprep.mubr.msk.bf16.mxu1 %vm2175_vm2, %v2174_v11 }
  0x52   : > { %1822 = vmatmul.mubr.msk.bf16.vlgmr.msra.gmra.mrb[12].mxu0 %vm334_vm1, %v324_v32  ;;  %1828 = vmatmul.mubr.msk.bf16.vlgmr.msra.gmra.mrb[12].mxu1 %vm334_vm1, %v325_v33 }
 0x10d   : > { %v2341_v34 = vpop.f32.mrb[0].mxu0  ;;  %v2343_v35 = vpop.f32.mrb[0].mxu1 }
 0x10e   : > { %v1787_v36 = vpop.f32.mrb[1].mxu0  ;;  %v1793_v37 = vpop.f32.mrb[1].mxu1  ;;  %v709_v2 = vadd.f32 (!%p1673_p1), %v2343_v35, %v2341_v34 }
 0x10f   : > { %v379_v38 = vpop.f32.mrb[2].mxu0  ;;  %v425_v39 = vpop.f32.mrb[2].mxu1 }
 0x110   : > { %v1788_v40 = vpop.f32.mrb[3].mxu0  ;;  %v1794_v41 = vpop.f32.mrb[3].mxu1 }
 0x115   : > { %v2345_v42 = vpop.f32.mrb[4].mxu0  ;;  %v2347_v43 = vpop.f32.mrb[4].mxu1 }
 0x116   : > { %v1799_v44 = vpop.f32.mrb[5].mxu0  ;;  %v1805_v45 = vpop.f32.mrb[5].mxu1  ;;  %v710_v3 = vadd.f32 (!%p1673_p1), %v709_v2, %v2345_v42 }
 0x117   : > { %v471_v46 = vpop.f32.mrb[6].mxu0  ;;  %v517_v47 = vpop.f32.mrb[6].mxu1 }
 0x118   : > { %v1800_v48 = vpop.f32.mrb[7].mxu0  ;;  %v1806_v49 = vpop.f32.mrb[7].mxu1  ;;  %v711_v4 = vadd.f32 (!%p1673_p1), %v710_v3, %v2347_v43 }
 0x11d   : > { %v2349_v50 = vpop.f32.mrb[8].mxu0  ;;  %v2351_v51 = vpop.f32.mrb[8].mxu1 }
 0x11e   : > { %v1811_v52 = vpop.f32.mrb[9].mxu0  ;;  %v1817_v53 = vpop.f32.mrb[9].mxu1  ;;  %v712_v5 = vadd.f32 (!%p1673_p1), %v711_v4, %v2349_v50 }
 0x11f   : > { %v563_v54 = vpop.f32.mrb[10].mxu0  ;;  %v609_v55 = vpop.f32.mrb[10].mxu1 }
 0x120   : > { %v1812_v56 = vpop.f32.mrb[11].mxu0  ;;  %v1818_v57 = vpop.f32.mrb[11].mxu1  ;;  %v713_v6 = vadd.f32 (!%p1673_p1), %v712_v5, %v2351_v51 }
 0x122   : > { %707 = sbr.rel (%p1673_p1) target bundleno = 303 (0x12f), region = 85 }
 0x125   : > { %v2353_v58 = vpop.f32.mrb[12].mxu0  ;;  %v2355_v59 = vpop.f32.mrb[12].mxu1 }
 0x126   : > { %v1823_v60 = vpop.f32.mrb[13].mxu0  ;;  %v1829_v61 = vpop.f32.mrb[13].mxu1  ;;  %v714_v7 = vadd.f32 (!%p1673_p1), %v713_v6, %v2353_v58 }
 0x127   : > { %v655_v62 = vpop.f32.mrb[14].mxu0  ;;  %v701_v63 = vpop.f32.mrb[14].mxu1 }
 0x128   : > { %v1824_v0 = vpop.f32.mrb[15].mxu0  ;;  %v1830_v1 = vpop.f32.mrb[15].mxu1  ;;  %v715_v8 = vadd.f32 (!%p1673_p1), %v714_v7, %v2355_v59 }
 0x12a   : > { %v716_v10 = vmul.f32 0.125, %v715_v8 }
 0x12c   : > { %v717_v11 = vadd.f32 %v716_v10, %v708_v9 }
 0x12e   : > { %718 = vst [vmem:[#allocation2] sm:$0xff] %v717_v11 }
 0x12f PF: > { %p719_p2 = scmp.gt.s32.totalorder %s2151_s18, 0  ;;  %p1674_p3 = scmp.le.s32.totalorder %s2151_s18, 0 }
 0x130   : > { %v2025_v12 = vld [vmem:[%s2561_s0] sm:$0xff] (!%p1674_p3)   ;;  %v2026_v13 = vld [vmem:[%s2561_s0 + $0x8] sm:$0xff] (!%p1674_p3)   ;;  %v2027_v14 = vld [vmem:[%s2561_s0 + $0x10] sm:$0xff] (!%p1674_p3)  }
 0x131   : > { %722 = sbr.rel (%p1674_p3) target bundleno = 1108 (0x454), region = 89  ;;  %1831 = vmatprep.subr.bf16.mxu0 (!%p1674_p3), %v2025_v12  ;;  %v2028_v15 = vld [vmem:[%s2561_s0 + $0x18] sm:$0xff] (!%p1674_p3)   ;;  %v723_v16 = vld [vmem:[#allocation3] sm:$0xff] (!%p1674_p3)  ;;  %v2029_v20 = vld [vmem:[%s2561_s0 + $0x20] sm:$0xff] (!%p1674_p3)  }
 0x132   : > { %1832 = vmatpush3.bf16.msra.mxu0 (!%p1674_p3), %v2025_v12  ;;  %v724_v17 = vmul.f32 (!%p1674_p3), %v723_v16, %v2341_v34  ;;  %v725_v18 = vmul.f32 (!%p1674_p3), %v723_v16, %v2343_v35  ;;  %v2030_v21 = vld [vmem:[%s2561_s0 + $0x28] sm:$0xff] (!%p1674_p3)   ;;  %v2031_v22 = vld [vmem:[%s2561_s0 + $0x30] sm:$0xff] (!%p1674_p3)   ;;  %v2032_v23 = vld [vmem:[%s2561_s0 + $0x38] sm:$0xff] (!%p1674_p3)   ;;  %v726_v24 = vmul.f32 (!%p1674_p3), %v723_v16, %v2345_v42  ;;  %v727_v25 = vmul.f32 (!%p1674_p3), %v723_v16, %v2347_v43 }
 0x133   : > { %1833 = vmatprep.subr.bf16.mxu0 (!%p1674_p3), %v2026_v13  ;;  %v728_v26 = vmul.f32 (!%p1674_p3), %v723_v16, %v2349_v50  ;;  %v729_v27 = vmul.f32 (!%p1674_p3), %v723_v16, %v2351_v51  ;;  %v730_v30 = vmul.f32 (!%p1674_p3), %v723_v16, %v2353_v58  ;;  %v731_v31 = vmul.f32 (!%p1674_p3), %v723_v16, %v2355_v59 }
 0x134   : > { %v732_v19 = vpack.c.bf16 (!%p1674_p3), %v725_v18, %v724_v17  ;;  %v733_v28 = vpack.c.bf16 (!%p1674_p3), %v727_v25, %v726_v24 }
 0x135   : > { %v734_v29 = vpack.c.bf16 (!%p1674_p3), %v729_v27, %v728_v26  ;;  %v735_v32 = vpack.c.bf16 (!%p1674_p3), %v731_v31, %v730_v30 }
 0x136   : > { %1834 = vmatpush3.bf16.msra.mxu0 (!%p1674_p3), %v2026_v13  ;;  %1847 = vmatprep.mubr.bf16.mxu0 (!%p1674_p3), %v732_v19 }
 0x137   : > { %1835 = vmatprep.subr.bf16.mxu0 (!%p1674_p3), %v2027_v14 }
 0x13a   : > { %1836 = vmatpush3.bf16.msra.mxu0 %v2027_v14 }
 0x13b   : > { %1837 = vmatprep.subr.bf16.mxu0 %v2028_v15 }
 0x13e   : > { %1838 = vmatpush3.bf16.msra.mxu0 %v2028_v15 }
 0x13f   : > { %1839 = vmatprep.subr.bf16.mxu0 %v2029_v20 }
 0x142   : > { %1840 = vmatpush3.bf16.msra.mxu0 %v2029_v20 }
 0x143   : > { %1841 = vmatprep.subr.bf16.mxu0 %v2030_v21 }
 0x146   : > { %1842 = vmatpush3.bf16.msra.mxu0 %v2030_v21 }
 0x147   : > { %1843 = vmatprep.subr.bf16.mxu0 %v2031_v22 }
 0x14a   : > { %1844 = vmatpush3.bf16.msra.mxu0 %v2031_v22 }
 0x14b   : > { %1845 = vmatprep.subr.bf16.mxu0 %v2032_v23 }
 0x14e   : > { %1846 = vmatpush3.bf16.msra.mxu0 %v2032_v23 }
 0x151   : > { %1848 = vmatmul.mubr.bf16.vlgmr.msra.gmra.mrb[0].mxu0 %v733_v28 }
 0x152   : > { %1851 = vmatprep.mubr.bf16.mxu0 %v734_v29 }
 0x159   : > { %1852 = vmatmul.mubr.bf16.gmra.mrb[4].mxu0 %v735_v32 }
 0x224   : > { %v1849_v33 = vpop.f32.mrb[0].mxu0 }
 0x225   : > { %v834_v36 = vpop.f32.mrb[1].mxu0  ;;  %v871_v37 = vsel %vm334_vm1, %v1849_v33, -inf }
 0x226   : > { %872 = vmax.xlane.f32.xlu1 %v871_v37  ;;  %v1850_v38 = vpop.f32.mrb[2].mxu0  ;;  %v865_v39 = vsel %vm334_vm1, %v834_v36, -inf }
 0x227   : > { %866 = vmax.xlane.f32.xlu0 %v865_v39  ;;  %v837_v40 = vpop.f32.mrb[3].mxu0  ;;  %v874_v41 = vsel %vm334_vm1, %v1850_v38, -inf }
 0x228   : > { %v868_v44 = vsel %vm334_vm1, %v837_v40, -inf }
 0x22a   : > { %875 = vmax.xlane.f32.xlu1 %v874_v41 }
 0x22b   : > { %869 = vmax.xlane.f32.xlu0 %v868_v44 }
 0x22c   : > { %v1853_v45 = vpop.f32.mrb[4].mxu0 }
 0x22d   : > { %v850_v46 = vpop.f32.mrb[5].mxu0  ;;  %v883_v53 = vsel %vm334_vm1, %v1853_v45, -inf }
 0x22e   : > { %v1854_v47 = vpop.f32.mrb[6].mxu0  ;;  %v877_v48 = vsel %vm334_vm1, %v850_v46, -inf }
 0x22f   : > { %878 = vmax.xlane.f32.xlu0 %v877_v48  ;;  %v853_v49 = vpop.f32.mrb[7].mxu0  ;;  %v886_v54 = vsel %vm334_vm1, %v1854_v47, -inf }
 0x230   : > { %v880_v52 = vsel %vm334_vm1, %v853_v49, -inf }
 0x231   : > { %881 = vmax.xlane.f32.xlu1 %v880_v52 }
 0x233   : > { %884 = vmax.xlane.f32.xlu0 %v883_v53 }
 0x235   : > { %887 = vmax.xlane.f32.xlu1 %v886_v54 }
 0x2b3   : > { %v873_v55 = vpop.xlane.xlu1 %872 }
 0x2b4   : > { %v891_v56 = vsub.f32 %v1849_v33, %v873_v55  ;;  %v867_v57 = vpop.xlane.xlu0 %866  ;;  %v957_v33 = vld [vmem:[%s2562_s1] sm:$0xf] }
 0x2b5   : > { %v889_v60 = vsub.f32 %v834_v36, %v867_v57  ;;  %1943 = vmatprep.subr.msk.bf16.mxu1 %vm338_vm0, %v957_v33  ;;  %v971_v36 = vsel %vm338_vm0, %v957_v33, 0 }
 0x2b6   : > { %v901_v61 = vmul.f32 1.442695, %v891_v56  ;;  %1856 = vmatpush3.bf16.msra.mxu1 %v971_v36 }
 0x2b7   : > { %v897_v62 = vmul.f32 1.442695, %v889_v60  ;;  %v876_v63 = vpop.xlane.xlu1 %875 }
 0x2b8   : > { %v892_v0 = vsub.f32 %v1850_v38, %v876_v63  ;;  %v870_v1 = vpop.xlane.xlu0 %869 }
 0x2b9   : > { %2033 = vpow2.f32 %v897_v62  ;;  %v890_v2 = vsub.f32 %v837_v40, %v870_v1 }
 0x2ba   : > { %2035 = vpow2.f32 %v901_v61  ;;  %v903_v3 = vmul.f32 1.442695, %v892_v0 }
 0x2bb   : > { %v899_v4 = vmul.f32 1.442695, %v890_v2 }
 0x2bc   : > { %v879_v5 = vpop.xlane.xlu0 %878 }
 0x2bd   : > { %2037 = vpow2.f32 %v899_v4  ;;  %v893_v6 = vsub.f32 %v850_v46, %v879_v5 }
 0x2be   : > { %v882_v7 = vpop.xlane.xlu1 %881  ;;  %2039 = vpow2.f32 %v903_v3 }
 0x2bf   : > { %v905_v8 = vmul.f32 1.442695, %v893_v6  ;;  %v894_v9 = vsub.f32 %v853_v49, %v882_v7 }
 0x2c0   : > { %v885_v10 = vpop.xlane.xlu0 %884 }
 0x2c1   : > { %2041 = vpow2.f32 %v905_v8  ;;  %v907_v11 = vmul.f32 1.442695, %v894_v9  ;;  %v895_v12 = vsub.f32 %v1853_v45, %v885_v10 }
 0x2c2   : > { %v888_v13 = vpop.xlane.xlu1 %887 }
 0x2c3   : > { %v2034_v14 = vpop.eup %2033  ;;  %2043 = vpow2.f32 %v907_v11  ;;  %v909_v15 = vmul.f32 1.442695, %v895_v12  ;;  %v896_v16 = vsub.f32 %v1854_v47, %v888_v13 }
 0x2c4   : > { %v913_v17 = vsel %vm334_vm1, %v2034_v14, 0.0  ;;  %v2036_v18 = vpop.eup %2035 }
 0x2c5   : > { %2045 = vpow2.f32 %v909_v15  ;;  %v911_v19 = vmul.f32 1.442695, %v896_v16  ;;  %914 = vadd.xlane.f32.xlu0 %v913_v17  ;;  %v919_v21 = vsel %vm334_vm1, %v2036_v18, 0.0 }
 0x2c7   : > { %v2038_v20 = vpop.eup %2037  ;;  %2047 = vpow2.f32 %v911_v19 }
 0x2c8   : > { %v916_v22 = vsel %vm334_vm1, %v2038_v20, 0.0  ;;  %v2040_v23 = vpop.eup %2039 }
 0x2c9   : > { %920 = vadd.xlane.f32.xlu0 %v919_v21  ;;  %917 = vadd.xlane.f32.xlu1 %v916_v22  ;;  %v922_v26 = vsel %vm334_vm1, %v2040_v23, 0.0 }
 0x2cb   : > { %v2042_v24 = vpop.eup %2041 }
 0x2cc   : > { %v925_v25 = vsel %vm334_vm1, %v2042_v24, 0.0 }
 0x2cd   : > { %v2044_v27 = vpop.eup %2043  ;;  %926 = vadd.xlane.f32.xlu0 %v925_v25  ;;  %923 = vadd.xlane.f32.xlu1 %v922_v26  ;;  %v1038_v26 = vld [vmem:[#allocation2] sm:$0xff] }
 0x2ce   : > { %v928_v30 = vsel %vm334_vm1, %v2044_v27, 0.0 }
 0x2cf   : > { %v2046_v28 = vpop.eup %2045 }
 0x2d0   : > { %v931_v29 = vsel %vm334_vm1, %v2046_v28, 0.0 }
 0x2d1   : > { %v2048_v31 = vpop.eup %2047  ;;  %932 = vadd.xlane.f32.xlu0 %v931_v29  ;;  %929 = vadd.xlane.f32.xlu1 %v928_v30 }
 0x2d2   : > { %v934_v32 = vsel %vm334_vm1, %v2048_v31, 0.0 }
 0x2d5   : > { %935 = vadd.xlane.f32.xlu1 %v934_v32 }
 0x352   : > { %v915_v37 = vpop.xlane.xlu0 %914 }
 0x353   : > { %2049 = vrcp.f32 %v915_v37 }
 0x356   : > { %v921_v38 = vpop.xlane.xlu0 %920  ;;  %v918_v39 = vpop.xlane.xlu1 %917 }
 0x357   : > { %2051 = vrcp.f32 %v918_v39 }
 0x358   : > { %2053 = vrcp.f32 %v921_v38 }
 0x35a   : > { %v927_v40 = vpop.xlane.xlu0 %926  ;;  %v924_v41 = vpop.xlane.xlu1 %923 }
 0x35b   : > { %2055 = vrcp.f32 %v924_v41 }
 0x35c   : > { %2057 = vrcp.f32 %v927_v40 }
 0x35d   : > { %v2050_v46 = vpop.eup %2049 }
 0x35e   : > { %v933_v44 = vpop.xlane.xlu0 %932  ;;  %v930_v45 = vpop.xlane.xlu1 %929  ;;  %v938_v49 = vmul.f32 %v2050_v46, %v2034_v14 }
 0x35f   : > { %2059 = vrcp.f32 %v930_v45 }
 0x360   : > { %2061 = vrcp.f32 %v933_v44 }
 0x361   : > { %v2052_v47 = vpop.eup %2051 }
 0x362   : > { %v936_v48 = vpop.xlane.xlu1 %935  ;;  %v940_v52 = vmul.f32 %v2052_v47, %v2038_v20  ;;  %v2054_v53 = vpop.eup %2053 }
 0x363   : > { %2063 = vrcp.f32 %v936_v48  ;;  %v942_v56 = vmul.f32 %v2054_v53, %v2036_v18 }
 0x364   : > { %v953_v54 = vpack.c.bf16 %v940_v52, %v938_v49 }
 0x365   : > { %v2056_v55 = vpop.eup %2055 }
 0x366   : > { %1857 = vmatprep.mubr.msk.bf16.mxu1 %vm334_vm1, %v953_v54  ;;  %v944_v57 = vmul.f32 %v2056_v55, %v2040_v23  ;;  %v2058_v60 = vpop.eup %2057 }
 0x367   : > { %v946_v0 = vmul.f32 %v2058_v60, %v2042_v24 }
 0x368   : > { %v954_v61 = vpack.c.bf16 %v944_v57, %v942_v56 }
 0x369   : > { %v2060_v62 = vpop.eup %2059 }
 0x36a   : > { %v2062_v63 = vpop.eup %2061  ;;  %1858 = vmatmul.mubr.msk.bf16.vlgmr.msra.gmra.mrb[0].mxu1 %vm334_vm1, %v954_v61  ;;  %v948_v1 = vmul.f32 %v2060_v62, %v2044_v27 }
 0x36b   : > { %v950_v4 = vmul.f32 %v2062_v63, %v2046_v28 }
 0x36c   : > { %v955_v3 = vpack.c.bf16 %v948_v1, %v946_v0 }
 0x36d   : > { %v2064_v2 = vpop.eup %2063 }
 0x36e   : > { %v952_v5 = vmul.f32 %v2064_v2, %v2048_v31  ;;  %1861 = vmatprep.mubr.msk.bf16.mxu1 %vm334_vm1, %v955_v3 }
 0x370   : > { %v956_v6 = vpack.c.bf16 %v952_v5, %v950_v4 }
 0x372   : > { %1862 = vmatmul.mubr.msk.bf16.gmra.mrb[4].mxu1 %vm334_vm1, %v956_v6 }
 0x43d   : > { %v1859_v7 = vpop.f32.mrb[0].mxu1 }
 0x43e   : > { %v1007_v8 = vpop.f32.mrb[1].mxu1  ;;  %v1041_v13 = vmul.f32 %v1859_v7, %v2345_v42 }
 0x43f   : > { %v1860_v9 = vpop.f32.mrb[2].mxu1  ;;  %v1039_v11 = vmul.f32 %v1007_v8, %v2341_v34 }
 0x440   : > { %v1010_v10 = vpop.f32.mrb[3].mxu1  ;;  %v1042_v15 = vmul.f32 %v1860_v9, %v2347_v43 }
 0x441   : > { %v1040_v12 = vmul.f32 %v1010_v10, %v2343_v35 }
 0x443   : > { %v1047_v14 = vadd.f32 %v1040_v12, %v1039_v11 }
 0x445   : > { %v1048_v16 = vadd.f32 %v1047_v14, %v1041_v13  ;;  %v1863_v17 = vpop.f32.mrb[4].mxu1 }
 0x446   : > { %v1023_v18 = vpop.f32.mrb[5].mxu1  ;;  %v1045_v34 = vmul.f32 %v1863_v17, %v2353_v58 }
 0x447   : > { %v1043_v19 = vmul.f32 %v1023_v18, %v2349_v50  ;;  %v1049_v20 = vadd.f32 %v1048_v16, %v1042_v15  ;;  %v1864_v21 = vpop.f32.mrb[6].mxu1 }
 0x448   : > { %v1026_v22 = vpop.f32.mrb[7].mxu1  ;;  %v1046_v35 = vmul.f32 %v1864_v21, %v2355_v59 }
 0x449   : > { %v1050_v23 = vadd.f32 %v1049_v20, %v1043_v19  ;;  %v1044_v24 = vmul.f32 %v1026_v22, %v2351_v51 }
 0x44b   : > { %v1051_v25 = vadd.f32 %v1050_v23, %v1044_v24 }
 0x44d   : > { %v1052_v42 = vadd.f32 %v1051_v25, %v1045_v34 }
 0x44f   : > { %v1053_v27 = vadd.f32 %v1052_v42, %v1046_v35 }
 0x451   : > { %v1054_v43 = vadd.f32 %v1053_v27, %v1038_v26 }
 0x453   : > { %1055 = vst [vmem:[#allocation2] sm:$0xff] %v1054_v43 }
 0x454 PF: > { %p1056_p4 = scmp.eq.s32.totalorder %s2147_s17, 3 }
 0x456   : > { %p1057_p5 = pnand %p1056_p4, %p704_p0 }
 0x457   : > { %v2065_v50 = vld [vmem:[%s2561_s0] sm:$0xff] (!%p1057_p5)   ;;  %v2176_v51 = vmov (!%p1057_p5), 0.0   ;;  %v2066_v58 = vld [vmem:[%s2561_s0 + $0x8] sm:$0xff] (!%p1057_p5)   ;;  %vm2177_vm3 = vmmov (!%p1057_p5), 0   ;;  %v2067_v59 = vld [vmem:[%s2561_s0 + $0x10] sm:$0xff] (!%p1057_p5)  }
 0x458   : > { %1060 = sbr.rel (%p1057_p5) target bundleno = 1588 (0x634), region = 93  ;;  %1865 = vmatprep.subr.bf16.mxu0 (!%p1057_p5), %v2176_v51  ;;  %1885 = vmatprep.subr.bf16.mxu1 (!%p1057_p5), %v2176_v51  ;;  %v2068_v28 = vld [vmem:[%s2561_s0 + $0x18] sm:$0xff] (!%p1057_p5)   ;;  %v2069_v29 = vld [vmem:[%s2561_s0 + $0x20] sm:$0xff] (!%p1057_p5)   ;;  %v2070_v30 = vld [vmem:[%s2561_s0 + $0x28] sm:$0xff] (!%p1057_p5)  }
 0x459   : > { %1866 = vmatpush3.bf16.msra.mxu0 (!%p1057_p5), %v2065_v50  ;;  %1881 = vmatprep.mubr.msk.bf16.mxu0 (!%p1057_p5), %vm2177_vm3, %v2176_v51  ;;  %v2071_v31 = vld [vmem:[%s2561_s0 + $0x30] sm:$0xff] (!%p1057_p5)   ;;  %v2072_v36 = vld [vmem:[%s2561_s0 + $0x38] sm:$0xff] (!%p1057_p5)   ;;  %v1078_v38 = vld [vmem:[%s2562_s1] sm:$0xf] (!%p1057_p5) }
 0x45a   : > { %1867 = vmatprep.subr.bf16.mxu0 (!%p1057_p5), %v2176_v51  ;;  %1887 = vmatprep.mubr.msk.bf16.mxu1 (!%p1057_p5), %vm2177_vm3, %v2176_v51  ;;  %v1061_v32 = vld [vmem:[#allocation2] sm:$0xff] (!%p1057_p5)  ;;  %v1179_v39 = vsel (!%p1057_p5), %vm338_vm0, %v1078_v38, 0 }
 0x45b   : > { %v1079_v33 = vmul.f32 (!%p1057_p5), %v1061_v32, %v1061_v32  ;;  %1886 = vmatpush3.bf16.msra.mxu1 (!%p1057_p5), %v1179_v39 }
 0x45d   : > { %1868 = vmatpush3.bf16.msra.mxu0 (!%p1057_p5), %v2066_v58  ;;  %v1080_v37 = vpack.c.bf16 (!%p1057_p5), %v1079_v33, %v1079_v33 }
 0x45e   : > { %1869 = vmatprep.subr.bf16.mxu0 (!%p1057_p5), %v2176_v51 }
 0x461   : > { %1870 = vmatpush3.bf16.msra.mxu0 %v2067_v59 }
 0x462   : > { %1871 = vmatprep.subr.bf16.mxu0 %v2176_v51 }
 0x465   : > { %1872 = vmatpush3.bf16.msra.mxu0 %v2068_v28 }
 0x466   : > { %1873 = vmatprep.subr.bf16.mxu0 %v2176_v51 }
 0x469   : > { %1874 = vmatpush3.bf16.msra.mxu0 %v2069_v29 }
 0x46a   : > { %1875 = vmatprep.subr.bf16.mxu0 %v2176_v51 }
 0x46d   : > { %1876 = vmatpush3.bf16.msra.mxu0 %v2070_v30 }
 0x46e   : > { %1877 = vmatprep.subr.bf16.mxu0 %v2176_v51 }
 0x471   : > { %1878 = vmatpush3.bf16.msra.mxu0 %v2071_v31 }
 0x472   : > { %1879 = vmatprep.subr.bf16.mxu0 %v2176_v51 }
 0x475   : > { %1880 = vmatpush3.bf16.msra.mxu0 %v2072_v36 }
 0x478   : > { %1882 = vmatmul.mubr.bf16.vlgmr.msra.gmra.mrb[0].mxu0 %v1080_v37 }
 0x54b   : > { %v1163_v40 = vpop.f32.mrb[0].mxu0 }
 0x54c   : > { %2073 = vrsqrt.f32 %v1163_v40  ;;  %v1171_v41 = vadd.f32 1.0, %v1163_v40  ;;  %v1883_v44 = vpop.f32.mrb[1].mxu0 }
 0x54d   : > { %v1166_v45 = vpop.f32.mrb[2].mxu0 }
 0x54e   : > { %2075 = vrcp.f32 %v1171_v41  ;;  %v1884_v46 = vpop.f32.mrb[3].mxu0 }
 0x556   : > { %v2074_v47 = vpop.eup %2073 }
 0x557   : > { %v1170_v48 = vmul.f32 %v2074_v47, %v1163_v40 }
 0x558   : > { %v2076_v49 = vpop.eup %2075 }
 0x559   : > { %v1173_v52 = vmul.f32 %v2076_v49, %v1170_v48 }
 0x55b   : > { %v1174_v53 = vpack.c.bf16 %v1173_v52, %v1173_v52 }
 0x55d   : > { %1888 = vmatmul.mubr.msk.bf16.vlgmr.msra.gmra.mrb[0].mxu1 %vm334_vm1, %v1174_v53 }
 0x630   : > { %v1215_v54 = vpop.f32.mrb[0].mxu1 }
 0x631   : > { %v1221_v55 = vmul.f32 %v1215_v54, %v1061_v32  ;;  %v1889_v56 = vpop.f32.mrb[1].mxu1 }
 0x632   : > { %v1218_v57 = vpop.f32.mrb[2].mxu1 }
 0x633   : > { %1222 = vst [vmem:[#allocation3] sm:$0xff] %v1221_v55  ;;  %v1890_v60 = vpop.f32.mrb[3].mxu1 }
 0x634 PF: > { %p1223_p6 = scmp.lt.s32.totalorder %s2151_s18, 2 }
 0x636   : > { %p1224_p7 = pnand %p1223_p6, %p719_p2 }
 0x638   : > { %p1225_p8 = pneg %p1224_p7 }
 0x63a   : > { %p1226_p9 = pnand %p1225_p8, %p1056_p4 }
 0x63b   : > { %v2077_v61 = vld [vmem:[%s2561_s0] sm:$0xff] (!%p1226_p9)   ;;  %v2178_v62 = vmov (!%p1226_p9), 0.0   ;;  %v2078_v63 = vld [vmem:[%s2561_s0 + $0x8] sm:$0xff] (!%p1226_p9)   ;;  %vm2179_vm4 = vmmov (!%p1226_p9), 0   ;;  %v2079_v0 = vld [vmem:[%s2561_s0 + $0x10] sm:$0xff] (!%p1226_p9)  }
 0x63c   : > { %1229 = sbr.rel (%p1226_p9) target bundleno = 2074 (0x81a), region = 97  ;;  %1891 = vmatprep.subr.bf16.mxu0 (!%p1226_p9), %v2178_v62  ;;  %1911 = vmatprep.subr.bf16.mxu1 (!%p1226_p9), %v2178_v62  ;;  %v2080_v1 = vld [vmem:[%s2561_s0 + $0x18] sm:$0xff] (!%p1226_p9)   ;;  %v2081_v2 = vld [vmem:[%s2561_s0 + $0x20] sm:$0xff] (!%p1226_p9)   ;;  %v2082_v3 = vld [vmem:[%s2561_s0 + $0x28] sm:$0xff] (!%p1226_p9)  }
 0x63d   : > { %1892 = vmatpush3.bf16.msra.mxu0 (!%p1226_p9), %v2077_v61  ;;  %1907 = vmatprep.mubr.msk.bf16.mxu0 (!%p1226_p9), %vm2179_vm4, %v2178_v62  ;;  %v2083_v4 = vld [vmem:[%s2561_s0 + $0x30] sm:$0xff] (!%p1226_p9)   ;;  %v1231_v5 = vld [vmem:[#allocation2] sm:$0xff] (!%p1226_p9)  ;;  %v2084_v7 = vld [vmem:[%s2561_s0 + $0x38] sm:$0xff] (!%p1226_p9)  }
 0x63e   : > { %1893 = vmatprep.subr.bf16.mxu0 (!%p1226_p9), %v2178_v62  ;;  %1913 = vmatprep.mubr.msk.bf16.mxu1 (!%p1226_p9), %vm2179_vm4, %v2178_v62  ;;  %v1249_v6 = vmul.f32 (!%p1226_p9), %v1231_v5, %v1231_v5  ;;  %v1248_v9 = vld [vmem:[%s2562_s1] sm:$0xf] (!%p1226_p9)  ;;  %v1230_v21 = vld [vmem:[#allocation3] sm:$0xff] (!%p1226_p9) }
 0x63f   : > { %v1349_v10 = vsel (!%p1226_p9), %vm338_vm0, %v1248_v9, 0 }
 0x640   : > { %v1250_v8 = vpack.c.bf16 (!%p1226_p9), %v1249_v6, %v1249_v6  ;;  %1912 = vmatpush3.bf16.msra.mxu1 (!%p1226_p9), %v1349_v10 }
 0x641   : > { %1894 = vmatpush3.bf16.msra.mxu0 (!%p1226_p9), %v2078_v63 }
 0x642   : > { %1895 = vmatprep.subr.bf16.mxu0 (!%p1226_p9), %v2178_v62 }
 0x645   : > { %1896 = vmatpush3.bf16.msra.mxu0 %v2079_v0 }
 0x646   : > { %1897 = vmatprep.subr.bf16.mxu0 %v2178_v62 }
 0x649   : > { %1898 = vmatpush3.bf16.msra.mxu0 %v2080_v1 }
 0x64a   : > { %1899 = vmatprep.subr.bf16.mxu0 %v2178_v62 }
 0x64d   : > { %1900 = vmatpush3.bf16.msra.mxu0 %v2081_v2 }
 0x64e   : > { %1901 = vmatprep.subr.bf16.mxu0 %v2178_v62 }
 0x651   : > { %1902 = vmatpush3.bf16.msra.mxu0 %v2082_v3 }
 0x652   : > { %1903 = vmatprep.subr.bf16.mxu0 %v2178_v62 }
 0x655   : > { %1904 = vmatpush3.bf16.msra.mxu0 %v2083_v4 }
 0x656   : > { %1905 = vmatprep.subr.bf16.mxu0 %v2178_v62 }
 0x659   : > { %1906 = vmatpush3.bf16.msra.mxu0 %v2084_v7 }
 0x65c   : > { %1908 = vmatmul.mubr.bf16.vlgmr.msra.gmra.mrb[0].mxu0 %v1250_v8 }
 0x72f   : > { %v1333_v11 = vpop.f32.mrb[0].mxu0 }
 0x730   : > { %2085 = vrsqrt.f32 %v1333_v11  ;;  %v1341_v12 = vadd.f32 1.0, %v1333_v11  ;;  %v1909_v13 = vpop.f32.mrb[1].mxu0 }
 0x731   : > { %v1336_v14 = vpop.f32.mrb[2].mxu0 }
 0x732   : > { %2087 = vrcp.f32 %v1341_v12  ;;  %v1910_v15 = vpop.f32.mrb[3].mxu0 }
 0x73a   : > { %v2086_v16 = vpop.eup %2085 }
 0x73b   : > { %v1340_v17 = vmul.f32 %v2086_v16, %v1333_v11 }
 0x73c   : > { %v2088_v18 = vpop.eup %2087 }
 0x73d   : > { %v1343_v19 = vmul.f32 %v2088_v18, %v1340_v17 }
 0x73f   : > { %v1344_v20 = vpack.c.bf16 %v1343_v19, %v1343_v19 }
 0x741   : > { %1914 = vmatmul.mubr.msk.bf16.vlgmr.msra.gmra.mrb[0].mxu1 %vm334_vm1, %v1344_v20 }
 0x814   : > { %v1385_v22 = vpop.f32.mrb[0].mxu1 }
 0x815   : > { %v1391_v23 = vmul.f32 %v1385_v22, %v1231_v5  ;;  %v1915_v24 = vpop.f32.mrb[1].mxu1 }
 0x816   : > { %v1388_v34 = vpop.f32.mrb[2].mxu1 }
 0x817   : > { %v1392_v25 = vadd.f32 %v1391_v23, %v1230_v21  ;;  %v1916_v35 = vpop.f32.mrb[3].mxu1 }
 0x819   : > { %1393 = vst [vmem:[#allocation3] sm:$0xff] %v1392_v25 }
 0x81a PF: > { %p1394_p10 = scmp.eq.s32.totalorder %s2151_s18, 2 }
 0x81c   : > { %p1395_p11 = pnand %p1394_p10, %p1056_p4 }
 0x81d   : > { %v2089_v42 = vld [vmem:[%s2561_s0] sm:$0xff] (!%p1395_p11)   ;;  %v2180_v26 = vmov (!%p1395_p11), 0.0   ;;  %v2090_v27 = vld [vmem:[%s2561_s0 + $0x8] sm:$0xff] (!%p1395_p11)   ;;  %vm2181_vm5 = vmmov (!%p1395_p11), 0   ;;  %v2091_v43 = vld [vmem:[%s2561_s0 + $0x10] sm:$0xff] (!%p1395_p11)  }
 0x81e   : > { %1398 = sbr.rel (%p1395_p11) target bundleno = 2554 (0x9fa), region = 101  ;;  %1917 = vmatprep.subr.bf16.mxu0 (!%p1395_p11), %v2180_v26  ;;  %1937 = vmatprep.subr.bf16.mxu1 (!%p1395_p11), %v2180_v26  ;;  %v2092_v50 = vld [vmem:[%s2561_s0 + $0x18] sm:$0xff] (!%p1395_p11)   ;;  %v2093_v51 = vld [vmem:[%s2561_s0 + $0x20] sm:$0xff] (!%p1395_p11)   ;;  %v2094_v58 = vld [vmem:[%s2561_s0 + $0x28] sm:$0xff] (!%p1395_p11)  }
 0x81f   : > { %1918 = vmatpush3.bf16.msra.mxu0 (!%p1395_p11), %v2089_v42  ;;  %1933 = vmatprep.mubr.msk.bf16.mxu0 (!%p1395_p11), %vm2181_vm5, %v2180_v26  ;;  %v2095_v59 = vld [vmem:[%s2561_s0 + $0x30] sm:$0xff] (!%p1395_p11)   ;;  %v1399_v28 = vld [vmem:[#allocation2] sm:$0xff] (!%p1395_p11)  ;;  %v2096_v30 = vld [vmem:[%s2561_s0 + $0x38] sm:$0xff] (!%p1395_p11)  }
 0x820   : > { %1919 = vmatprep.subr.bf16.mxu0 (!%p1395_p11), %v2180_v26  ;;  %1939 = vmatprep.mubr.msk.bf16.mxu1 (!%p1395_p11), %vm2181_vm5, %v2180_v26  ;;  %v1417_v29 = vmul.f32 (!%p1395_p11), %v1399_v28, %v1399_v28  ;;  %v1416_v32 = vld [vmem:[%s2562_s1] sm:$0xf] (!%p1395_p11) }
 0x821   : > { %v1517_v33 = vsel (!%p1395_p11), %vm338_vm0, %v1416_v32, 0 }
 0x822   : > { %v1418_v31 = vpack.c.bf16 (!%p1395_p11), %v1417_v29, %v1417_v29  ;;  %1938 = vmatpush3.bf16.msra.mxu1 (!%p1395_p11), %v1517_v33 }
 0x823   : > { %1920 = vmatpush3.bf16.msra.mxu0 (!%p1395_p11), %v2090_v27 }
 0x824   : > { %1921 = vmatprep.subr.bf16.mxu0 (!%p1395_p11), %v2180_v26 }
 0x827   : > { %1922 = vmatpush3.bf16.msra.mxu0 %v2091_v43 }
 0x828   : > { %1923 = vmatprep.subr.bf16.mxu0 %v2180_v26 }
 0x82b   : > { %1924 = vmatpush3.bf16.msra.mxu0 %v2092_v50 }
 0x82c   : > { %1925 = vmatprep.subr.bf16.mxu0 %v2180_v26 }
 0x82f   : > { %1926 = vmatpush3.bf16.msra.mxu0 %v2093_v51 }
 0x830   : > { %1927 = vmatprep.subr.bf16.mxu0 %v2180_v26 }
 0x833   : > { %1928 = vmatpush3.bf16.msra.mxu0 %v2094_v58 }
 0x834   : > { %1929 = vmatprep.subr.bf16.mxu0 %v2180_v26 }
 0x837   : > { %1930 = vmatpush3.bf16.msra.mxu0 %v2095_v59 }
 0x838   : > { %1931 = vmatprep.subr.bf16.mxu0 %v2180_v26 }
 0x83b   : > { %1932 = vmatpush3.bf16.msra.mxu0 %v2096_v30 }
 0x83e   : > { %1934 = vmatmul.mubr.bf16.vlgmr.msra.gmra.mrb[0].mxu0 %v1418_v31 }
 0x911   : > { %v1501_v36 = vpop.f32.mrb[0].mxu0 }
 0x912   : > { %2097 = vrsqrt.f32 %v1501_v36  ;;  %v1509_v37 = vadd.f32 1.0, %v1501_v36  ;;  %v1935_v38 = vpop.f32.mrb[1].mxu0 }
 0x913   : > { %v1504_v39 = vpop.f32.mrb[2].mxu0 }
 0x914   : > { %2099 = vrcp.f32 %v1509_v37  ;;  %v1936_v40 = vpop.f32.mrb[3].mxu0 }
 0x91c   : > { %v2098_v41 = vpop.eup %2097 }
 0x91d   : > { %v1508_v44 = vmul.f32 %v2098_v41, %v1501_v36 }
 0x91e   : > { %v2100_v45 = vpop.eup %2099 }
 0x91f   : > { %v1511_v46 = vmul.f32 %v2100_v45, %v1508_v44 }
 0x921   : > { %v1512_v47 = vpack.c.bf16 %v1511_v46, %v1511_v46 }
 0x923   : > { %1940 = vmatmul.mubr.msk.bf16.vlgmr.msra.gmra.mrb[0].mxu1 %vm334_vm1, %v1512_v47 }
 0x9f6   : > { %v1553_v48 = vpop.f32.mrb[0].mxu1 }
 0x9f7   : > { %v1559_v49 = vmul.f32 %v1553_v48, %v1399_v28  ;;  %v1941_v52 = vpop.f32.mrb[1].mxu1 }
 0x9f8   : > { %v1556_v53 = vpop.f32.mrb[2].mxu1 }
 0x9f9   : > { %1560 = vst [vmem:[%s2295_s12] sm:$0xff] %v1559_v49  ;;  %v1942_v54 = vpop.f32.mrb[3].mxu1 }
 0x9fa PF: > { %s14_s23 = sadd.s32 1, %s2171_s23   ;;  %s2566_s15 = smov %s2143_s16 }
 0x9fb   : > { %p11_p12 = scmp.ge.s32.totalorder %s14_s23, 26   ;;  %s2567_s16 = smov %s2272_s5 }
 0x9fc   : > { %s2568_s17 = smov %s2159_s20  ;;  %s2569_s18 = smov %s2163_s21 }
 0x9fd   : > { %s2570_s19 = smov %s2167_s22  ;;  %s2571_s20 = smov %s2575_s24 }
 0x9fe   : > { %s2572_s21 = smov %s2579_s25  ;;  %s2573_s22 = smov %s2583_s26 }
 0x9ff   :  { %13 = sbr.rel (!%p11_p12) target bundleno = 5 (0x5), region = 139 }

</bundles_post_ra>
